<compile_context>
chip_gen: v5e
topology: v5e:2x2
jax: 0.10.0
libtpu: 0.0.40
codegen_flags: <defaults>
</compile_context>

<pallas_src>
import math

import jax
import jax.numpy as jnp
from jax.experimental import pallas as pl
from jax.experimental.pallas import tpu as pltpu


# ---------------------------------------------------------------------------
# Kernel 1: fused QKV in-projection (row-tiled, optional output-column tiling).
# ---------------------------------------------------------------------------
def _qkv_proj_kernel(x_ref, w_ref, b_ref, qkv_ref):
    # x_ref: (1, tr, E) bf16   w_ref: (E, tn) bf16   b_ref: (1, tn) f32
    # qkv_ref: (1, tr, tn) bf16
    acc = jnp.dot(x_ref[0], w_ref[...], preferred_element_type=jnp.float32)
    qkv_ref[0] = (acc + b_ref[...]).astype(qkv_ref.dtype)


def _qkv_projection(x_bf, w_in_t, b_in2, *, tr, col_tiles):
    B, S, E = x_bf.shape
    E3 = w_in_t.shape[1]
    tn = E3 // col_tiles

    flops = 2 * B * S * E * E3
    bytes_accessed = (B * S * E * 2 * col_tiles   # x (re-read once per column tile)
                      + E * E3 * 2                # weight
                      + B * S * E3 * 2            # qkv out (bf16)
                      + E3 * 4)                   # bias

    return pl.pallas_call(
        _qkv_proj_kernel,
        out_shape=jax.ShapeDtypeStruct((B, S, E3), jnp.bfloat16),
        grid_spec=pltpu.PrefetchScalarGridSpec(
            num_scalar_prefetch=0,
            grid=(B, S // tr, col_tiles),
            in_specs=[
                pl.BlockSpec((1, tr, E), lambda b, r, c: (b, r, 0)),
                pl.BlockSpec((E, tn), lambda b, r, c: (0, c)),
                pl.BlockSpec((1, tn), lambda b, r, c: (0, c)),
            ],
            out_specs=pl.BlockSpec((1, tr, tn), lambda b, r, c: (b, r, c)),
        ),
        compiler_params=pltpu.CompilerParams(
            dimension_semantics=("parallel", "parallel", "parallel"),
            vmem_limit_bytes=64 * 1024 * 1024),
        cost_estimate=pl.CostEstimate(
            flops=flops, transcendentals=0, bytes_accessed=bytes_accessed),
    )(x_bf, w_in_t, b_in2)


# ---------------------------------------------------------------------------
# Kernel 2: flash-style attention (online softmax) + fused out-projection.
# ---------------------------------------------------------------------------
def _flash_attn_outproj_kernel(q_ref, k_ref, v_ref, w_out_h_ref, b_out_ref,
                               o_ref, m_sc, l_sc, acc_sc):
    # q_ref: (1, H, tq, hd) bf16   k_ref / v_ref: (1, H, tk, hd) bf16
    # w_out_h_ref: (H, hd, E) bf16   b_out_ref: (1, E) f32   o_ref: (1, tq, E)
    # scratch (f32): m_sc / l_sc: (H, tq, 1), acc_sc: (H, tq, hd)
    ki = pl.program_id(2)

    @pl.when(ki == 0)
    def _():
        m_sc[...] = jnp.full_like(m_sc, -jnp.inf)
        l_sc[...] = jnp.zeros_like(l_sc)
        acc_sc[...] = jnp.zeros_like(acc_sc)

    q = q_ref[0]                       # (H, tq, hd) bf16; softmax scale folded in
    k = k_ref[0]                       # (H, tk, hd) bf16
    v = v_ref[0]                       # (H, tk, hd) bf16

    # All heads in one batched MXU contraction, f32 accumulation.
    s = jnp.einsum('hqd,hkd->hqk', q, k,
                   preferred_element_type=jnp.float32)          # (H, tq, tk) f32

    # Online softmax in f32 (v5e VPU/EUP have no bf16; keeps stats accurate).
    m_prev = m_sc[...]
    m_new = jnp.maximum(m_prev, s.max(axis=-1, keepdims=True))  # (H, tq, 1)
    alpha = jnp.exp(m_prev - m_new)
    p = jnp.exp(s - m_new)
    l_sc[...] = alpha * l_sc[...] + p.sum(axis=-1, keepdims=True)
    acc_sc[...] = alpha * acc_sc[...] + jnp.einsum(
        'hqk,hkd->hqd', p.astype(v.dtype), v,                   # p genuinely bf16
        preferred_element_type=jnp.float32)                     # (H, tq, hd) f32
    m_sc[...] = m_new

    @pl.when(ki == pl.num_programs(2) - 1)
    def _():
        # Normalize once at the end; approx reciprocal runs on the EUP slot.
        ctx = acc_sc[...] * pl.reciprocal(l_sc[...], approx=True)   # (H, tq, hd) f32
        # Fused out-projection: one batched head matmul (bf16 operands, f32 acc)
        # followed by a cheap VPU sum over heads; no concat, no per-head loop of
        # dependent adds, lane-dense (tq, E) result.
        o_h = jnp.einsum('hqd,hde->hqe', ctx.astype(w_out_h_ref.dtype),
                         w_out_h_ref[...],
                         preferred_element_type=jnp.float32)        # (H, tq, E) f32
        out = jnp.sum(o_h, axis=0) + b_out_ref[...]                 # (tq, E) f32
        o_ref[0] = out.astype(o_ref.dtype)


# ---------------------------------------------------------------------------
# Wrapper
# ---------------------------------------------------------------------------
def self_attention_pallas(x, w_in, b_in, w_out, b_out, *, num_heads,
                          q_tile=None, kv_tile=None, row_tile=None):
    """x: (B, S, E). Weights follow nn.MultiheadAttention conventions:
       w_in (3E, E), b_in (3E,), w_out (E, E), b_out (E,)."""
    B, S, E = x.shape
    assert E % num_heads == 0
    hd = E // num_heads

    def _pick(t, default):
        t = default if t is None else t
        t = min(t, S)
        assert S % t == 0, "sequence length must be divisible by the tile size"
        return t

    # Grow tq first (K/V HBM re-reads scale with S/tq); keep tk at 256.
    tq = _pick(q_tile, 512)
    tk = _pick(kv_tile, 256)
    tr = _pick(row_tile, 256)
    # Dual-TensorCore chips (v7x): keep at least two parallel q programs when B==1.
    if B == 1 and q_tile is None and S % 16 == 0 and S // tq < 2:
        tq = S // 2

    # --- one-off glue on tiny tensors: fold softmax scale into the q projection,
    #     cast matmul operands to bf16 (f32 accumulation stays in-kernel) --------
    scale = 1.0 / math.sqrt(hd)
    w_q, w_k, w_v = w_in[:E], w_in[E:2 * E], w_in[2 * E:]
    b_q, b_k, b_v = b_in[:E], b_in[E:2 * E], b_in[2 * E:]
    w_in_t = jnp.concatenate([w_q * scale, w_k, w_v], axis=0).T.astype(jnp.bfloat16)
    b_in2 = jnp.concatenate([b_q * scale, b_k, b_v]).reshape(1, 3 * E).astype(jnp.float32)
    w_out_heads = w_out.T.reshape(num_heads, hd, E).astype(jnp.bfloat16)   # (H, hd, E)
    b_out2 = b_out.reshape(1, E).astype(jnp.float32)
    x_bf = x.astype(jnp.bfloat16)

    # Tile the in-projection weight's output columns only when the resident
    # (E, 3E) bf16 weight (double-buffered) would crowd VMEM; column tiling costs
    # extra x re-reads, so keep a single tile at common sizes.
    col_tiles = 1 if (E * 3 * E * 2 * 2) <= (24 << 20) else 3

    # --- kernel 1: QKV projection (bf16 out) -----------------------------------
    qkv = _qkv_projection(x_bf, w_in_t, b_in2, tr=tr, col_tiles=col_tiles)  # (B,S,3E)

    # --- layout plumbing (XLA, once in HBM, bf16 = half the old bytes): heads-major
    def split_heads(t):                                               # (B,S,E)->(B,H,S,hd)
        return t.reshape(B, S, num_heads, hd).transpose(0, 2, 1, 3)
    q = split_heads(qkv[..., 0 * E:1 * E])
    k = split_heads(qkv[..., 1 * E:2 * E])
    v = split_heads(qkv[..., 2 * E:3 * E])

    # --- kernel 2: flash attention + fused out-projection -----------------------
    flops = 4 * B * S * S * E + 2 * B * S * E * E
    transcendentals = B * num_heads * S * S
    bytes_accessed = (B * S * E * 2                       # q (bf16)
                      + 2 * B * S * E * 2 * (S // tq)     # k, v re-fetched per q tile
                      + B * S * E * 4                     # output (f32)
                      + num_heads * hd * E * 2            # out-projection weight
                      + E * 4)

    return pl.pallas_call(
        _flash_attn_outproj_kernel,
        out_shape=jax.ShapeDtypeStruct((B, S, E), x.dtype),
        grid_spec=pltpu.PrefetchScalarGridSpec(
            num_scalar_prefetch=0,
            grid=(B, S // tq, S // tk),
            in_specs=[
                pl.BlockSpec((1, num_heads, tq, hd), lambda b, qi, ki: (b, 0, qi, 0)),
                pl.BlockSpec((1, num_heads, tk, hd), lambda b, qi, ki: (b, 0, ki, 0)),
                pl.BlockSpec((1, num_heads, tk, hd), lambda b, qi, ki: (b, 0, ki, 0)),
                pl.BlockSpec((num_heads, hd, E), lambda b, qi, ki: (0, 0, 0)),
                pl.BlockSpec((1, E), lambda b, qi, ki: (0, 0)),
            ],
            out_specs=pl.BlockSpec((1, tq, E), lambda b, qi, ki: (b, qi, 0)),
            scratch_shapes=[
                pltpu.VMEM((num_heads, tq, 1), jnp.float32),   # running max
                pltpu.VMEM((num_heads, tq, 1), jnp.float32),   # running denom
                pltpu.VMEM((num_heads, tq, hd), jnp.float32),  # context accumulator
            ],
        ),
        compiler_params=pltpu.CompilerParams(
            dimension_semantics=("parallel", "parallel", "arbitrary"),
            vmem_limit_bytes=64 * 1024 * 1024),
        cost_estimate=pl.CostEstimate(
            flops=flops, transcendentals=transcendentals,
            bytes_accessed=bytes_accessed),
    )(q, k, v, w_out_heads, b_out2)


# ---------------------------------------------------------------------------
# Pure-JAX reference matching nn.MultiheadAttention forward (f32).
# ---------------------------------------------------------------------------
def self_attention_ref(x, w_in, b_in, w_out, b_out, *, num_heads):
    B, S, E = x.shape
    hd = E // num_heads
    qkv = jnp.einsum('bse,fe->bsf', x, w_in) + b_in       # (B, S, 3E)
    q, k, v = jnp.split(qkv, 3, axis=-1)
    q = q.reshape(B, S, num_heads, hd)
    k = k.reshape(B, S, num_heads, hd)
    v = v.reshape(B, S, num_heads, hd)
    s = jnp.einsum('bqhd,bkhd->bhqk', q, k) / math.sqrt(hd)
    p = jax.nn.softmax(s, axis=-1)
    ctx = jnp.einsum('bhqk,bkhd->bqhd', p, v).reshape(B, S, E)
    return jnp.einsum('bse,fe->bsf', ctx, w_out) + b_out


if __name__ == "__main__":
    B, S, E, H = 2, 8, 32, 4

    key = jax.random.PRNGKey(0)
    kx, k1, k2, k3, k4 = jax.random.split(key, 5)

    x = jax.random.normal(kx, (B, S, E), dtype=jnp.float32)

    # Deterministic synthetic parameters (nn.MultiheadAttention shapes).
    w_in = 0.05 * jax.random.normal(k1, (3 * E, E), dtype=jnp.float32)
    b_in = 0.05 * jax.random.normal(k2, (3 * E,), dtype=jnp.float32)
    w_out = 0.05 * jax.random.normal(k3, (E, E), dtype=jnp.float32)
    b_out = 0.05 * jax.random.normal(k4, (E,), dtype=jnp.float32)

    out = self_attention_pallas(x, w_in, b_in, w_out, b_out, num_heads=H)
    out = jax.block_until_ready(out)

    ref = self_attention_ref(x, w_in, b_in, w_out, b_out, num_heads=H)
    assert out.shape == (B, S, E)
    # Tolerance accounts for bf16 matmul operands + approx (EUP) reciprocal.
    max_err = jnp.max(jnp.abs(out - ref))
    assert jnp.allclose(out, ref, atol=2e-2, rtol=2e-2), f"max err {max_err}"

    print("KERNEL_OK")
</pallas_src>

<mosaic_0001>
module attributes {stable_mosaic.version = 11 : i64} {
  func.func @_qkv_proj_kernel(%arg0: i32, %arg1: i32, %arg2: i32, %arg3: memref<1x8x32xbf16, #tpu.memory_space<vmem>>, %arg4: memref<32x96xbf16, #tpu.memory_space<vmem>>, %arg5: memref<1x96xf32, #tpu.memory_space<vmem>>, %arg6: memref<1x8x96xbf16, #tpu.memory_space<vmem>>) attributes {dimension_semantics = [#tpu.dimension_semantics<parallel>, #tpu.dimension_semantics<parallel>, #tpu.dimension_semantics<parallel>], iteration_bounds = array<i64: 2, 1, 1>, scalar_prefetch = 0 : i64, scratch_operands = 0 : i64, tpu.core_type = #tpu.core_type<tc>, window_params = [{transform_indices = @transform_0, window_bounds = array<i64: 1, 8, 32>}, {transform_indices = @transform_1, window_bounds = array<i64: 32, 96>}, {transform_indices = @transform_2, window_bounds = array<i64: 1, 96>}, {transform_indices = @transform_3, window_bounds = array<i64: 1, 8, 96>}]} {
    %c0 = arith.constant 0 : index
    %c0_0 = arith.constant 0 : index
    %c0_1 = arith.constant 0 : index
    %0 = vector.load %arg3[%c0, %c0_0, %c0_1] : memref<1x8x32xbf16, #tpu.memory_space<vmem>>, vector<1x8x32xbf16>
    %1 = vector.shape_cast %0 : vector<1x8x32xbf16> to vector<8x32xbf16>
    %c0_2 = arith.constant 0 : index
    %c0_3 = arith.constant 0 : index
    %2 = vector.load %arg4[%c0_2, %c0_3] : memref<32x96xbf16, #tpu.memory_space<vmem>>, vector<32x96xbf16>
    %cst = arith.constant dense<0.000000e+00> : vector<8x96xf32>
    %3 = tpu.matmul %1, %2, %cst {dimension_numbers = #tpu.dot_dimension_numbers<[1], [0], [0], [1], [0, 0, 1, 1], [], []>} : vector<8x32xbf16>, vector<32x96xbf16>, vector<8x96xf32> -> vector<8x96xf32>
    %c0_4 = arith.constant 0 : index
    %c0_5 = arith.constant 0 : index
    %4 = vector.load %arg5[%c0_4, %c0_5] : memref<1x96xf32, #tpu.memory_space<vmem>>, vector<1x96xf32>
    %5 = vector.broadcast %4 : vector<1x96xf32> to vector<8x96xf32>
    %6 = arith.addf %3, %5 : vector<8x96xf32>
    %7 = arith.truncf %6 : vector<8x96xf32> to vector<8x96xbf16>
    %c0_6 = arith.constant 0 : index
    %c0_7 = arith.constant 0 : index
    %c0_8 = arith.constant 0 : index
    %8 = vector.load %arg6[%c0_6, %c0_7, %c0_8] : memref<1x8x96xbf16, #tpu.memory_space<vmem>>, vector<1x8x96xbf16>
    %9 = vector.shape_cast %8 : vector<1x8x96xbf16> to vector<8x96xbf16>
    %10 = vector.shape_cast %7 : vector<8x96xbf16> to vector<1x8x96xbf16>
    tpu.vector_store %arg6[%c0_6, %c0_7, %c0_8], %10 {strides = array<i32>} : memref<1x8x96xbf16, #tpu.memory_space<vmem>>, vector<1x8x96xbf16>,
    return
  }
  func.func @transform_0(%arg0: i32, %arg1: i32, %arg2: i32) -> (i32, i32, i32) {
    %c0_i32 = arith.constant 0 : i32
    %c0_i32_0 = arith.constant 0 : i32
    return %arg0, %arg1, %c0_i32 : i32, i32, i32
  }
  func.func @transform_1(%arg0: i32, %arg1: i32, %arg2: i32) -> (i32, i32) {
    %c0_i32 = arith.constant 0 : i32
    %c0_i32_0 = arith.constant 0 : i32
    return %c0_i32, %arg2 : i32, i32
  }
  func.func @transform_2(%arg0: i32, %arg1: i32, %arg2: i32) -> (i32, i32) {
    %c0_i32 = arith.constant 0 : i32
    %c0_i32_0 = arith.constant 0 : i32
    return %c0_i32, %arg2 : i32, i32
  }
  func.func @transform_3(%arg0: i32, %arg1: i32, %arg2: i32) -> (i32, i32, i32) {
    %c0_i32 = arith.constant 0 : i32
    return %arg0, %arg1, %arg2 : i32, i32, i32
  }
}

</mosaic_0001>

<bundles_post_ra>
// kernel: tpu_custom_call.1
= control target key start
LH: loop header
LB: loop body
LE: loop exit
PB: predicated region body
PF: predicated region fallthrough
CT: control target
= control target key end

     0   :  { %8 = vsyncpa [#allocation3], 0  ;;  %s840_s0 = inlined_call_operand.hbm [shape: bf16[2,8,32], index: 0, kind: input, shape index: {}]   ;;  %s841_s1 = inlined_call_operand.hbm [shape: bf16[32,96], index: 1, kind: input, shape index: {}]   ;;  %s842_s2 = inlined_call_operand.vmem [shape: f32[1,96], index: 2, kind: input, shape index: {}]   ;;  %s843_s3 = inlined_call_operand.hbm [shape: bf16[2,8,96], index: 3, kind: output, shape index: {}]  }
   0x1   :  { %10 = vsyncpa [#allocation3 + $0x1], 0 }
   0x2   :  { %11 = vsyncpa [#allocation6], 0 }
   0x3   :  { %12 = vsyncpa [#allocation4], 0 }
   0x4   :  { %14 = vsyncpa [#allocation4 + $0x1], 0  ;;  %s694_s12 = smov 0   ;;  %s696_s13 = smov 0  }
   0x5   :  { %s698_s14 = smov 0   ;;  %s700_s15 = smov 0  }
   0x6   :  { %s702_s16 = smov 0   ;;  %s704_s17 = smov 0  }
   0x7 LB: > { %s420_s18 = sadd.s32 4294967295, %s669_s17   ;;  %p422_p0 = scmp.ge.s32.totalorder %s669_s17, 1  ;;  %s669_s17 = sphi %s704_s17, %s20_s17   ;;  %s665_s16 = sphi %s702_s16, %s854_s16   ;;  %s661_s15 = sphi %s700_s15, %s853_s15   ;;  %s657_s14 = sphi %s698_s14, %s852_s14   ;;  %s653_s13 = sphi %s696_s13, %s851_s13   ;;  %s649_s12 = sphi %s694_s12, %s850_s12  }
   0x8   : > { %p726_p1 = scmp.eq.s32.totalorder %s420_s18, 0  ;;  %p154_p2 = scmp.lt.s32.totalorder %s669_s17, 3 }
   0x9   : > { %s167_s22 = sshll.u32 %s841_s1, 4  ;;  %s671_s24 = smov [#allocation5]   ;;  %s168_s22 = int_to_ptr.hbm [resolvable:$true] %s167_s22 }
   0xa   : > { %p734_p3 = pnand %p422_p0, %p154_p2  ;;  %s169_s25 = sshll.u32 %s671_s24, 4  ;;  %s170_s25 = int_to_ptr.vmem [resolvable:$true] %s169_s25 }
   0xb   : > { %p425_p6 = scmp.ge.s32.totalorder %s669_s17, 2  ;;  %s672_s26 = smov 64  }
   0xc   : > { %p455_p4 = pneg %p734_p3  ;;  %s673_s27 = smov 4  }
   0xd   : > { %s421_s28 = sadd.s32 4294967294, %s669_s17   ;;  %s39_s29 = sadd.s32 1, %s665_s16 }
   0xe   : > { %p456_p5 = pnand %p455_p4, %p726_p1  ;;  %s48_s30 = sadd.s32 1, %s657_s14 }
   0xf   : > { %p41_p7 = scmp.ge.s32.totalorder %s39_s29, 2  ;;  %p55_p8 = scmp.ne.s32.totalorder %s657_s14, %s653_s13 }
  0x10   : > { %458 = dma.hbm_to_vmem [thread:$0]  (!%p456_p5), %s168_s22, 256, %s170_s25, [#allocation6], %s672_s26, %s672_s26, %s673_s27  }
  0x11   : > { %p56_p9 = scmp.eq.s32.totalorder %s669_s17, 0  ;;  %p61_p10 = scmp.ne.s32.totalorder %s653_s13, %s649_s12 }
  0x12   : > { %s856_s29 = smov (%p41_p7, %s39_s29), 0  ;;  %p141_p13 = scmp.eq.s32.totalorder %s420_s18, 1 }
  0x13   : > { %p753_p11 = por %p56_p9, %p55_p8  ;;  %p759_p12 = por %p726_p1, %p61_p10 }
  0x14   : > { %s43_s6 = ssub.s32 %s665_s16, %s856_s29  ;;  %p147_p2 = scmp.eq.s32.totalorder %s421_s28, 1 }
  0x15   : > { %p46_p0 = scmp.eq.s32.totalorder %s43_s6, 0  ;;  %p765_p4 = por %p141_p13, %p55_p8 }
  0x16   : > { %p468_p5 = scmp.lt.s32.totalorder %s669_s17, 2  ;;  %p773_p7 = por %p147_p2, %p61_p10 }
  0x17   : > { %s771_s8 = scalar_select %p46_p0, %s657_s14, %s48_s30  }
  0x18   : > { %s189_s10 = sand.u32 1, %s657_s14   ;;  %s427_s20 = sshll.u32 %s665_s16, 2 }
  0x19   : > { %s426_s11 = sshll.u32 %s189_s10, 2  ;;  %s198_s18 = scalar_lea.hbm %s840_s0, %s427_s20 }
  0x1a   : > { %s193_s24 = scalar_lea.vmem [#allocation2], %s426_s11  ;;  %s200_s26 = sshll.u32 %s198_s18, 4  ;;  %s201_s26 = int_to_ptr.hbm [resolvable:$true] %s200_s26 }
  0x1b   : > { %s202_s25 = sshll.u32 %s193_s24, 4  ;;  %p460_p8 = pnand %p468_p5, %p753_p11  ;;  %s203_s25 = int_to_ptr.vmem [resolvable:$true] %s202_s25 }
  0x1c   : > { %s190_s27 = scalar_lea.sflag [#allocation3], %s189_s10  ;;  %211 = sbr.rel (%p734_p3) target bundleno = 178 (0xb2), region = 32 }
  0x1d   : > { %462 = dma.hbm_to_vmem [thread:$0]  (!%p460_p8), %s201_s26, 64, %s203_s25, %s190_s27  }
  0x1e   : > { %s787_s28 = sand.u32 (!%p734_p3), 1, %s653_s13  }
  0x1f   : > { %s429_s30 = sshll.u32 (!%p734_p3), %s787_s28, 2  ;;  %s214_s6 = scalar_lea.sflag (!%p734_p3), [#allocation3], %s787_s28 }
  0x20   : > { %s217_s11 = scalar_lea.vmem (!%p734_p3), [#allocation2], %s429_s30 }
  0x21   : > { %636 = dma.done.wait (%p759_p12), %s214_s6, 64  }
  0x22   : > { %638 = vsyncadd (%p759_p12), %s214_s6, 4294967232 }
  0x23   : > { %640 = dma.done.wait (%p726_p1), [#allocation6], 256  }
  0x24   : > { %642 = vsyncadd (%p726_p1), [#allocation6], 4294967040  ;;  %v446_v0 = vld [vmem:[#allocation5 + $0x8] sm:$0xff]  ;;  %v445_v1 = vld [vmem:[#allocation5] sm:$0xff]  ;;  %vm274_vm0 = vcmask 261120   ;;  %s442_s23 = sshll.u32 %s661_s15, 2 }
  0x25   : > { %284 = vmatpush.bf16.msra.mxu0 %v446_v0  ;;  %v253_v2 = vld [vmem:[%s217_s11] sm:$0xf]  ;;  %s307_s21 = scalar_lea.hbm %s843_s3, %s442_s23  ;;  %s248_s19 = scalar_lea.vmem [#allocation7], %s429_s30  ;;  %vm292_vm1 = vcmask 781312  }
  0x26   : > { %v522_v3 = vld [vmem:[%s842_s2] ss:$0 sm:$0xff]  ;;  %s309_s22 = sshll.u32 %s248_s19, 4  ;;  %s311_s18 = sshll.u32 %s307_s21, 4  ;;  %s310_s22 = int_to_ptr.vmem [resolvable:$true] %s309_s22  ;;  %s312_s18 = int_to_ptr.hbm [resolvable:$true] %s311_s18 }
  0x27   : > { %s295_s15 = scalar_lea.sflag [#allocation4], %s787_s28  ;;  %s597_s24 = sshra.s32 %s312_s18, 4  ;;  %s598_s24 = int_to_ptr.hbm [resolvable:$true] %s597_s24 }
  0x28   : > { %s599_s25 = scalar_lea.hbm %s598_s24, 4  ;;  %s603_s30 = scalar_lea.hbm %s843_s3, 8 }
  0x29   : > { %285 = vmatpush.bf16.msra.mxu0 %v445_v1  ;;  %p600_p1 = scmp.ne.s32.totalorder %s598_s24, %s599_s25  ;;  %p604_p10 = scmp.lt.s32.totalorder %s598_s24, %s843_s3 }
  0x2a   : > { %p605_p11 = scmp.lt.s32.totalorder %s603_s30, %s599_s25 }
  0x2b   : > { %p601_p3 = pnand %p600_p1, %p765_p4 }
  0x2c   : > { %440 = vmatmul.msk.bf16.vlgmr.msra.gmra.mxu0 %vm274_vm0, %v253_v2  ;;  %p606_p12 = por %p605_p11, %p604_p10 }
  0x2d   : > { %p602_p9 = pneg %p601_p3 }
  0x2f   : > { %p607_p13 = pnand %p606_p12, %p602_p9 }
  0xa9   : > { %v287_v4 = vpop.f32.mrf.mxu0 }
  0xaa   : > { %v288_v5 = vadd.f32 %v522_v3, %v287_v4 }
  0xac   : > { %v291_v6 = vpack.c.bf16 %v288_v5, %v288_v5 }
  0xae   : > { %293 = vst.msk [vmem:[%s248_s19] sm:$0xf] %vm292_vm1, %v291_v6 }
  0xaf   : > { %610 = shalt.err (!%p607_p13)
}
  0xb0   : > { %453 = dma.vmem_to_hbm [thread:$0]  (%p765_p4), %s310_s22, 64, %s312_s18, %s295_s15  }
  0xb1   : > { %v289_v7 = vpop.f32.mrf.mxu0 }
  0xb2 PF: > { %s323_s28 = sand.u32 1, %s649_s12   ;;  %p464_p0 = pnand %p425_p6, %p773_p7 }
  0xb3   : > { %s324_s23 = scalar_lea.sflag [#allocation4], %s323_s28 }
  0xb4   : > { %p465_p2 = pneg %p464_p0 }
  0xb6   : > { %644 = dma.done.wait (%p465_p2), %s324_s23, 64  }
  0xb7   : > { %646 = vsyncadd (%p465_p2), %s324_s23, 4294967232  ;;  %s20_s17 = sadd.s32 1, %s669_s17   ;;  %s850_s12 = smov %s653_s13 }
  0xb8   : > { %p17_p5 = scmp.ge.s32.totalorder %s20_s17, 4   ;;  %s851_s13 = smov %s657_s14 }
  0xb9   : > { %s852_s14 = smov %s771_s8  ;;  %s853_s15 = smov %s665_s16 }
  0xba   : > { %s854_s16 = smov %s856_s29  ;;  %19 = sbr.rel (!%p17_p5) target bundleno = 7 (0x7), region = 85 }
  0xbf   :  { %330 = vsyncpa [#allocation3], 1 }
  0xc0   :  { %332 = vsyncpa [#allocation3 + $0x1], 1 }
  0xc1   :  { %333 = vsyncpa [#allocation6], 1 }
  0xc2   :  { %334 = vsyncpa [#allocation4], 1 }
  0xc3   :  { %336 = vsyncpa [#allocation4 + $0x1], 1 }

</bundles_post_ra>
